<compile_context>
chip_gen: v7x
topology: tpu7x:2x2x1
jax: 0.10.0
libtpu: 0.0.40
codegen_flags: <defaults>
</compile_context>

<pallas_src>
import jax
import jax.numpy as jnp
from jax import lax
from jax.experimental import pallas as pl
from jax.experimental.pallas import tpu as pltpu

RATIO = 0.95


def _make_random_walk_kernel(matmul_dtype):
    def kernel(qf_ref, gf_ref, res_ref):
        q = qf_ref[...]                                     # (TB, 1, D)
        g = gf_ref[...]                                     # (TB, G, D)
        tb, G, _ = g.shape

        # d[b, m, f] = (qf[b, f] - gf[b, m, f])^2
        d = (q - g) ** 2                                    # (TB, G, D)

        # w[b, i, j] = exp(-||g_i - g_j||^2) via Gram matrix on the MXU.
        g_mm = g.astype(matmul_dtype)
        gram = jnp.einsum("bid,bjd->bij", g_mm, g_mm,
                          preferred_element_type=jnp.float32)        # (TB, G, G)
        sq = jnp.sum(g * g, axis=-1)                                  # (TB, G)
        dist = sq[:, :, None] + sq[:, None, :] - 2.0 * gram
        dist = jnp.maximum(dist, 0.0)   # guard tiny negatives from cancellation
        w = jnp.exp(-dist)                                            # symmetric

        # preprocess_sggnn_adj: adj = softmax(w - 100 * diag(w)·I, axis=0).
        # diag(w) == exp(0) == 1 exactly, so the masked diagonal is exactly -99.
        ii = lax.broadcasted_iota(jnp.int32, (tb, G, G), 1)
        jj = lax.broadcasted_iota(jnp.int32, (tb, G, G), 2)
        adj = jnp.where(ii == jj, -99.0, w)

        # Row softmax of the symmetric adj == (column softmax)^T, so the result
        # feeds straight into the matmul with no explicit transpose.
        m = jnp.max(adj, axis=-1, keepdims=True)
        e = jnp.exp(adj - m)
        denom = jnp.sum(e, axis=-1, keepdims=True)
        # approx=True would push the divide onto the EUP for ~free, but is kept
        # exact here to stay within the 1e-4 validation tolerance.
        w_norm_t = e * pl.reciprocal(denom, approx=False)             # (TB, G, G)

        # d_new[b,k,f] = 0.95 * sum_m w_norm[b,m,k] * d[b,m,f] + 0.05 * d[b,k,f]
        wd = jnp.einsum("bkm,bmf->bkf",
                        w_norm_t.astype(matmul_dtype), d.astype(matmul_dtype),
                        preferred_element_type=jnp.float32)           # (TB, G, D)
        d_new = RATIO * wd + (1.0 - RATIO) * d

        s = jnp.sum(d_new * d_new, axis=-1)                           # (TB, G)
        res_ref[...] = jnp.exp(-s)[:, None, :]                        # (TB, 1, G)

    return kernel


def _pick_tb(B, G, D, budget_bytes=8 * 1024 * 1024):
    """Largest batch tile that (a) divides B, (b) keeps the per-step VMEM
    working set well under the default scoped VMEM on every generation
    (including v7x's smaller budget), and (c) leaves >= 2 grid steps when
    possible so the parallel batch axis can shard across v7x's two cores."""
    # f32 per batch row: double-buffered qf/gf/out blocks + d, wd/d_new
    # + ~4 live (G, G) temporaries.
    per_row = 4 * (2 * (D + G * D + G) + 3 * G * D + 4 * G * G)
    tb_max = max(1, min(B, budget_bytes // max(per_row, 1)))
    tb = 1
    for cand in range(1, tb_max + 1):
        if B % cand == 0:
            tb = cand
    if B // tb < 2:
        for cand in range(tb - 1, 0, -1):
            if B % cand == 0 and B // cand >= 2:
                tb = cand
                break
    return tb


def random_walk(qf, gf, *, tb=None, matmul_dtype=jnp.float32,
                vmem_limit_bytes=None):
    """Pallas implementation of Random_walk.forward.

    Returns (index, result): `index` matches the PyTorch module's return value
    (descending argsort of the score per query); `result` is the (B, G) score
    the kernel computes, exposed for verification.

    On v6e/v7x production shapes, pass matmul_dtype=jnp.bfloat16 to run both
    MXU matmuls at full rate (accumulation stays f32); the f32 default keeps
    numerics tight against the reference at validation tolerance.
    """
    B, D = qf.shape
    Bg, G, Dg = gf.shape
    assert (Bg, Dg) == (B, D)

    if tb is None:
        tb = _pick_tb(B, G, D)
    assert B % tb == 0, f"batch tile {tb} must divide batch {B}"

    qf3 = qf.reshape(B, 1, D)
    kernel = _make_random_walk_kernel(matmul_dtype)

    res = pl.pallas_call(
        kernel,
        out_shape=jax.ShapeDtypeStruct((B, 1, G), jnp.float32),
        grid_spec=pltpu.PrefetchScalarGridSpec(
            num_scalar_prefetch=0,
            grid=(B // tb,),
            in_specs=[
                pl.BlockSpec((tb, 1, D), lambda b: (b, 0, 0)),
                pl.BlockSpec((tb, G, D), lambda b: (b, 0, 0)),
            ],
            out_specs=pl.BlockSpec((tb, 1, G), lambda b: (b, 0, 0)),
        ),
        compiler_params=pltpu.CompilerParams(
            dimension_semantics=("parallel",),
            vmem_limit_bytes=vmem_limit_bytes,
        ),
    )(qf3, gf)

    result = res.reshape(B, G)
    # TODO(synk): no Pallas/TPU sort primitive; descending argsort done in plain JAX.
    index = jnp.argsort(-result, axis=-1)
    return index, result


def _random_walk_ref(qf, gf):
    """Pure-JAX reference mirroring the PyTorch forward, for verification."""
    B, G, D = gf.shape
    d = (qf[:, None, :] - gf) ** 2                                   # (B, G, D)
    diff = gf[:, :, None, :] - gf[:, None, :, :]                     # (B, G, G, D)
    w = jnp.exp(-jnp.sum(diff * diff, axis=-1))                      # (B, G, G)
    eye = jnp.eye(G, dtype=w.dtype)
    adj = w - 100.0 * w * eye
    w_norm = jax.nn.softmax(adj, axis=1)                             # softmax over dim 0 per batch
    d_new = RATIO * jnp.einsum("bmk,bmf->bkf", w_norm, d) + (1.0 - RATIO) * d
    result = jnp.exp(-jnp.sum(d_new * d_new, axis=-1))               # (B, G)
    return result


if __name__ == "__main__":
    key = jax.random.PRNGKey(0)
    k1, k2 = jax.random.split(key)
    B, G, D = 2, 8, 32
    # Scale features so the exp(-distance) scores stay in a non-degenerate range.
    qf = 0.1 * jax.random.normal(k1, (B, D), dtype=jnp.float32)
    gf = 0.1 * jax.random.normal(k2, (B, G, D), dtype=jnp.float32)

    index, result = random_walk(qf, gf)
    jax.block_until_ready((index, result))

    result_ref = _random_walk_ref(qf, gf)
    assert result.shape == (B, G) and index.shape == (B, G)
    assert jnp.allclose(result, result_ref, atol=1e-4, rtol=1e-4), "mismatch vs JAX reference"

    print("KERNEL_OK")
</pallas_src>

<mosaic_0001>
module attributes {stable_mosaic.version = 11 : i64} {
  func.func @kernel(%arg0: i32, %arg1: memref<1x1x32xf32, #tpu.memory_space<vmem>>, %arg2: memref<1x8x32xf32, #tpu.memory_space<vmem>>, %arg3: memref<1x1x8xf32, #tpu.memory_space<vmem>>) attributes {dimension_semantics = [#tpu.dimension_semantics<parallel>], iteration_bounds = array<i64: 2>, scalar_prefetch = 0 : i64, scratch_operands = 0 : i64, tpu.core_type = #tpu.core_type<tc>, window_params = [{transform_indices = @transform_0, window_bounds = array<i64: 1, 1, 32>}, {transform_indices = @transform_1, window_bounds = array<i64: 1, 8, 32>}, {transform_indices = @transform_2, window_bounds = array<i64: 1, 1, 8>}]} {
    %c0 = arith.constant 0 : index
    %c0_0 = arith.constant 0 : index
    %c0_1 = arith.constant 0 : index
    %0 = vector.load %arg1[%c0, %c0_0, %c0_1] : memref<1x1x32xf32, #tpu.memory_space<vmem>>, vector<1x1x32xf32>
    %c0_2 = arith.constant 0 : index
    %c0_3 = arith.constant 0 : index
    %c0_4 = arith.constant 0 : index
    %1 = vector.load %arg2[%c0_2, %c0_3, %c0_4] : memref<1x8x32xf32, #tpu.memory_space<vmem>>, vector<1x8x32xf32>
    %2 = vector.broadcast %0 : vector<1x1x32xf32> to vector<1x8x32xf32>
    %3 = arith.subf %2, %1 : vector<1x8x32xf32>
    %4 = arith.mulf %3, %3 : vector<1x8x32xf32>
    "tpu.trace_start"() <{level = 10 : i32, message = "bid,bjd->bij"}> : () -> ()
    %cst = arith.constant dense<0.000000e+00> : vector<1x8x8xf32>
    %5 = tpu.matmul %1, %1, %cst {dimension_numbers = #tpu.dot_dimension_numbers<[2], [2], [1], [1], [0, 0, 0, 1, 1, 1], [0], [0]>} : vector<1x8x32xf32>, vector<1x8x32xf32>, vector<1x8x8xf32> -> vector<1x8x8xf32>
    "tpu.trace_stop"() : () -> ()
    %6 = arith.mulf %1, %1 : vector<1x8x32xf32>
    %cst_5 = arith.constant dense<0.000000e+00> : vector<1x8xf32>
    %7 = vector.multi_reduction <add>, %6, %cst_5 [2] : vector<1x8x32xf32> to vector<1x8xf32>
    %8 = vector.shape_cast %7 : vector<1x8xf32> to vector<1x8x1xf32>
    %9 = vector.shape_cast %7 : vector<1x8xf32> to vector<1x1x8xf32>
    %10 = vector.broadcast %8 : vector<1x8x1xf32> to vector<1x8x8xf32>
    %11 = vector.broadcast %9 : vector<1x1x8xf32> to vector<1x8x8xf32>
    %12 = arith.addf %10, %11 : vector<1x8x8xf32>
    %cst_6 = arith.constant 2.000000e+00 : f32
    %13 = vector.broadcast %cst_6 : f32 to vector<1x8x8xf32>
    %14 = arith.mulf %13, %5 : vector<1x8x8xf32>
    %15 = arith.subf %12, %14 : vector<1x8x8xf32>
    %cst_7 = arith.constant 0.000000e+00 : f32
    %16 = vector.broadcast %cst_7 : f32 to vector<1x8x8xf32>
    %17 = arith.maximumf %15, %16 : vector<1x8x8xf32>
    %cst_8 = arith.constant 0.000000e+00 : f32
    %18 = vector.broadcast %cst_8 : f32 to vector<1x8x8xf32>
    %19 = arith.subf %18, %17 : vector<1x8x8xf32>
    %20 = math.exp %19 : vector<1x8x8xf32>
    %21 = tpu.iota {dimensions = array<i32: 1>} : vector<1x8x8xi32>
    %22 = tpu.iota {dimensions = array<i32: 2>} : vector<1x8x8xi32>
    %23 = arith.cmpi eq, %21, %22 : vector<1x8x8xi32>
    %cst_9 = arith.constant -9.900000e+01 : f32
    %24 = vector.broadcast %cst_9 : f32 to vector<1x8x8xf32>
    %25 = arith.select %23, %24, %20 : vector<1x8x8xi1>, vector<1x8x8xf32>
    %cst_10 = arith.constant dense<0xFF800000> : vector<1x8xf32>
    %26 = vector.multi_reduction <maximumf>, %25, %cst_10 [2] : vector<1x8x8xf32> to vector<1x8xf32>
    %27 = vector.shape_cast %26 : vector<1x8xf32> to vector<1x8x1xf32>
    %28 = vector.broadcast %27 : vector<1x8x1xf32> to vector<1x8x8xf32>
    %29 = arith.subf %25, %28 : vector<1x8x8xf32>
    %30 = math.exp %29 : vector<1x8x8xf32>
    %cst_11 = arith.constant dense<0.000000e+00> : vector<1x8xf32>
    %31 = vector.multi_reduction <add>, %30, %cst_11 [2] : vector<1x8x8xf32> to vector<1x8xf32>
    %32 = vector.shape_cast %31 : vector<1x8xf32> to vector<1x8x1xf32>
    %33 = tpu.reciprocal %32 : vector<1x8x1xf32> -> vector<1x8x1xf32>
    %34 = vector.broadcast %33 : vector<1x8x1xf32> to vector<1x8x8xf32>
    %35 = arith.mulf %30, %34 : vector<1x8x8xf32>
    "tpu.trace_start"() <{level = 10 : i32, message = "bkm,bmf->bkf"}> : () -> ()
    %cst_12 = arith.constant dense<0.000000e+00> : vector<1x8x32xf32>
    %36 = tpu.matmul %35, %4, %cst_12 {dimension_numbers = #tpu.dot_dimension_numbers<[2], [1], [1], [2], [0, 0, 0, 1, 1, 2], [0], [0]>} : vector<1x8x8xf32>, vector<1x8x32xf32>, vector<1x8x32xf32> -> vector<1x8x32xf32>
    "tpu.trace_stop"() : () -> ()
    %cst_13 = arith.constant 0.949999988 : f32
    %37 = vector.broadcast %cst_13 : f32 to vector<1x8x32xf32>
    %38 = arith.mulf %37, %36 : vector<1x8x32xf32>
    %cst_14 = arith.constant 5.000000e-02 : f32
    %39 = vector.broadcast %cst_14 : f32 to vector<1x8x32xf32>
    %40 = arith.mulf %39, %4 : vector<1x8x32xf32>
    %41 = arith.addf %38, %40 : vector<1x8x32xf32>
    %42 = arith.mulf %41, %41 : vector<1x8x32xf32>
    %cst_15 = arith.constant dense<0.000000e+00> : vector<1x8xf32>
    %43 = vector.multi_reduction <add>, %42, %cst_15 [2] : vector<1x8x32xf32> to vector<1x8xf32>
    %cst_16 = arith.constant 0.000000e+00 : f32
    %44 = vector.broadcast %cst_16 : f32 to vector<1x8xf32>
    %45 = arith.subf %44, %43 : vector<1x8xf32>
    %46 = math.exp %45 : vector<1x8xf32>
    %47 = vector.shape_cast %46 : vector<1x8xf32> to vector<1x1x8xf32>
    %c0_17 = arith.constant 0 : index
    %c0_18 = arith.constant 0 : index
    %c0_19 = arith.constant 0 : index
    %48 = vector.load %arg3[%c0_17, %c0_18, %c0_19] : memref<1x1x8xf32, #tpu.memory_space<vmem>>, vector<1x1x8xf32>
    tpu.vector_store %arg3[%c0_17, %c0_18, %c0_19], %47 {strides = array<i32>} : memref<1x1x8xf32, #tpu.memory_space<vmem>>, vector<1x1x8xf32>,
    return
  }
  func.func @transform_0(%arg0: i32) -> (i32, i32, i32) {
    %c0_i32 = arith.constant 0 : i32
    %c0_i32_0 = arith.constant 0 : i32
    %c0_i32_1 = arith.constant 0 : i32
    return %arg0, %c0_i32, %c0_i32_0 : i32, i32, i32
  }
  func.func @transform_1(%arg0: i32) -> (i32, i32, i32) {
    %c0_i32 = arith.constant 0 : i32
    %c0_i32_0 = arith.constant 0 : i32
    %c0_i32_1 = arith.constant 0 : i32
    return %arg0, %c0_i32, %c0_i32_0 : i32, i32, i32
  }
  func.func @transform_2(%arg0: i32) -> (i32, i32, i32) {
    %c0_i32 = arith.constant 0 : i32
    %c0_i32_0 = arith.constant 0 : i32
    %c0_i32_1 = arith.constant 0 : i32
    return %arg0, %c0_i32, %c0_i32_0 : i32, i32, i32
  }
}

</mosaic_0001>

<bundles_post_ra>
// kernel: tpu_custom_call.1
= control target key start
LH: loop header
LB: loop body
LE: loop exit
PB: predicated region body
PF: predicated region fallthrough
CT: control target
= control target key end

     0   :  { %7 = vsyncpa [#allocation3], 0  ;;  %s969_s0 = inlined_call_operand.hbm [shape: f32[2,1,32], index: 0, kind: input, shape index: {}]   ;;  %s970_s1 = inlined_call_operand.hbm [shape: f32[2,8,32], index: 1, kind: input, shape index: {}]   ;;  %s971_s2 = inlined_call_operand.hbm [shape: f32[2,1,8], index: 2, kind: output, shape index: {}]  }
   0x1   :  { %9 = vsyncpa [#allocation3 + $0x1], 0 }
   0x2   :  { %10 = vsyncpa [#allocation6], 0 }
   0x3   :  { %12 = vsyncpa [#allocation6 + $0x1], 0 }
   0x4   :  { %13 = vsyncpa [#allocation4], 0 }
   0x5   :  { %15 = vsyncpa [#allocation4 + $0x1], 0  ;;  %s755_s9 = smov 0   ;;  %s757_s10 = smov 0  }
   0x6   :  { %s759_s11 = smov 0   ;;  %s761_s12 = smov 0  }
   0x7 LB: > { %s776_s13 = sadd.s32 4294967295, %s733_s12   ;;  %s513_s14 = sadd.s32 4294967294, %s733_s12   ;;  %s733_s12 = sphi %s761_s12, %s990_s12   ;;  %s729_s11 = sphi %s759_s11, %s989_s11   ;;  %s725_s10 = sphi %s757_s10, %s988_s10   ;;  %s721_s9 = sphi %s755_s9, %s987_s9  }
   0x8   : > { %s780_s15 = sadd.s32 1, %s733_s12   ;;  %s28_s16 = sadd.s32 1, %s729_s11 }
   0x9   : > { %s25_s17 = ssub.s32 %s733_s12, %s780_s15  ;;  %p35_p0 = scmp.ne.s32.totalorder %s729_s11, %s725_s10 }
   0xa   : > { %p26_p1 = scmp.eq.s32.totalorder %s25_s17, 0  ;;  %p36_p2 = scmp.eq.s32.totalorder %s733_s12, 0 }
   0xb   : > { %p41_p3 = scmp.ne.s32.totalorder %s725_s10, %s721_s9  ;;  %p42_p4 = scmp.eq.s32.totalorder %s776_s13, 0 }
   0xc   : > { %s792_s18 = scalar_select %p26_p1, %s729_s11, %s28_s16  }
   0xd   : > { %p794_p5 = por %p36_p2, %p35_p0  ;;  %p798_p6 = por %p42_p4, %p41_p3 }
   0xe   : > { %p91_p7 = scmp.eq.s32.totalorder %s776_s13, 1  ;;  %p97_p8 = scmp.eq.s32.totalorder %s513_s14, 1 }
   0xf   : > { %s975_s20 = scalar_select %p798_p6, 1, 0 }
  0x10   : > { %p559_p10 = scmp.lt.s32.totalorder %s733_s12, 2  ;;  %p805_p11 = por %p91_p7, %p35_p0 }
  0x11   : > { %p809_p12 = por %p97_p8, %p41_p3  ;;  %s814_s23 = sand.u32 1, %s729_s11  }
  0x12   : > { %s976_s21 = scalar_select %p805_p11, 1, 0 }
  0x13   : > { %s977_s22 = scalar_select %p809_p12, 1, 0 }
  0x14   : > { %s516_s24 = sshll.u32 %s733_s12, 4  ;;  %s120_s28 = scalar_lea.vmem [#allocation2], %s814_s23 }
  0x15   : > { %s820_s27 = scalar_lea.hbm %s969_s0, %s516_s24  ;;  %s127_s29 = sshll.u32 %s120_s28, 4  ;;  %s823_s29 = int_to_ptr.vmem [resolvable:$true] %s127_s29 }
  0x16   : > { %p827_p13 = pnand %p559_p10, %p794_p5  ;;  %s118_s3 = scalar_lea.sflag [#allocation3], %s814_s23 }
  0x17   : > { %s603_s4 = scalar_lea.hbm %s820_s27, 16  ;;  %s608_s7 = scalar_lea.hbm %s969_s0, 32 }
  0x18   : > { %p604_p2 = scmp.ne.s32.totalorder %s820_s27, %s603_s4  ;;  %p605_p3 = pneg %p827_p13 }
  0x19   : > { %p609_p5 = scmp.lt.u32.totalorder %s820_s27, %s969_s0  ;;  %p610_p8 = scmp.lt.u32.totalorder %s608_s7, %s603_s4 }
  0x1a   : > { %p606_p4 = pnand %p605_p3, %p604_p2  ;;  %p612_p9 = scmp.lt.u32.totalorder %s603_s4, %s820_s27 }
  0x1b   : > { %p611_p10 = por %p610_p8, %p609_p5 }
  0x1c   : > { %p607_p7 = pneg %p606_p4 }
  0x1d   : > { %p613_p0 = por %p612_p9, %p611_p10 }
  0x1f   : > { %p614_p1 = pnand %p613_p0, %p607_p7 }
  0x21   : > { %617 = shalt.err (!%p614_p1)
}
  0x22   : > { %s618_s16 = scalar_lea.vmem %s823_s29, 16  ;;  %s735_s17 = smov [#allocation2]  }
  0x23   : > { %p619_p2 = scmp.ne.s32.totalorder %s823_s29, %s618_s16  ;;  %s623_s19 = sshll.u32 %s735_s17, 4  ;;  %s624_s19 = int_to_ptr.vmem [resolvable:$false] %s623_s19 }
  0x24   : > { %s625_s24 = scalar_lea.vmem %s624_s19, 32  ;;  %p626_p11 = scmp.lt.s32.totalorder %s823_s29, %s624_s19 }
  0x25   : > { %p621_p4 = pnand %p619_p2, %p605_p3  ;;  %p627_p5 = scmp.lt.s32.totalorder %s625_s24, %s618_s16 }
  0x27   : > { %p622_p12 = pneg %p621_p4  ;;  %p628_p8 = por %p627_p5, %p626_p11 }
  0x29   : > { %p629_p9 = pnand %p628_p8, %p622_p12 }
  0x2b   : > { %632 = shalt.err (!%p629_p9)
}
  0x2c   : > { %551 = dma.hbm_to_vmem [thread:$0]  (!%p827_p13), %s820_s27, 16, %s823_s29, %s118_s3  }
  0x2d   : > { %p979_p0 = scmp.lt.s32.totalorder %s733_s12, 3  ;;  %p980_p1 = scmp.ge.s32.totalorder %s733_s12, 1 }
  0x2e   : > { %s517_s26 = sshll.u32 %s814_s23, 3  ;;  %s518_s28 = sshll.u32 %s733_s12, 7 }
  0x2f   : > { %p863_p7 = pnand %p980_p1, %p979_p0  ;;  %s872_s6 = scalar_lea.hbm %s970_s1, %s518_s28 }
  0x30   : > { %s138_s7 = scalar_lea.vmem [#allocation5], %s517_s26  ;;  %s135_s27 = scalar_lea.sflag [#allocation6], %s814_s23 }
  0x31   : > { %s981_s25 = scalar_select %p863_p7, 1, 0 }
  0x32   : > { %s145_s8 = sshll.u32 %s138_s7, 4  ;;  %s633_s29 = scalar_lea.hbm %s872_s6, 128  ;;  %s146_s8 = int_to_ptr.vmem [resolvable:$true] %s145_s8 }
  0x33   : > { %p634_p11 = scmp.ne.s32.totalorder %s872_s6, %s633_s29  ;;  %s638_s16 = scalar_lea.hbm %s970_s1, 256 }
  0x34   : > { %p639_p2 = scmp.lt.u32.totalorder %s872_s6, %s970_s1  ;;  %p640_p4 = scmp.lt.u32.totalorder %s638_s16, %s633_s29 }
  0x35   : > { %p636_p12 = pnand %p634_p11, %p605_p3  ;;  %p642_p8 = scmp.lt.u32.totalorder %s633_s29, %s872_s6 }
  0x36   : > { %p641_p5 = por %p640_p4, %p639_p2 }
  0x37   : > { %p637_p10 = pneg %p636_p12 }
  0x38   : > { %p643_p9 = por %p642_p8, %p641_p5 }
  0x3a   : > { %p644_p0 = pnand %p643_p9, %p637_p10 }
  0x3c   : > { %647 = shalt.err (!%p644_p0)
}
  0x3d   : > { %s648_s23 = scalar_lea.vmem %s146_s8, 128  ;;  %s736_s24 = smov [#allocation5]  }
  0x3e   : > { %p649_p1 = scmp.ne.s32.totalorder %s146_s8, %s648_s23  ;;  %s653_s26 = sshll.u32 %s736_s24, 4  ;;  %s654_s26 = int_to_ptr.vmem [resolvable:$false] %s653_s26 }
  0x3f   : > { %s655_s28 = scalar_lea.vmem %s654_s26, 256  ;;  %p656_p6 = scmp.lt.s32.totalorder %s146_s8, %s654_s26 }
  0x40   : > { %p651_p11 = pnand %p649_p1, %p605_p3  ;;  %p657_p7 = scmp.lt.s32.totalorder %s655_s28, %s648_s23 }
  0x42   : > { %p652_p12 = pneg %p651_p11  ;;  %p658_p2 = por %p657_p7, %p656_p6 }
  0x44   : > { %p659_p4 = pnand %p658_p2, %p652_p12 }
  0x46   : > { %662 = shalt.err (!%p659_p4)
}
  0x47   : > { %554 = dma.hbm_to_vmem [thread:$0]  (!%p827_p13), %s872_s6, 128, %s146_s8, %s135_s27  }
  0x48   : > { %p982_p10 = scmp.ne.s32.totalorder %s981_s25, 0 }
  0x49   : > { %s897_s4 = sand.u32 (!%p982_p10), 1, %s725_s10   ;;  %p983_p3 = scmp.ne.s32.totalorder (!%p982_p10), %s975_s20, 0 }
  0x4a   : > { %154 = sbr.rel (%p982_p10) target bundleno = 1031 (0x407), region = 28  ;;  %s157_s5 = scalar_lea.sflag (!%p982_p10), [#allocation3], %s897_s4 }
  0x4b   : > { %s159_s7 = scalar_lea.vmem (!%p982_p10), [#allocation2], %s897_s4 }
  0x51   : > { %708 = dma.done.wait (%p983_p3), %s157_s5, 16  }
  0x52   : > { %710 = vsyncadd (%p983_p3), %s157_s5, 4294967280  ;;  %s520_s30 = sshll.u32 %s897_s4, 3  ;;  %s165_s6 = scalar_lea.sflag [#allocation6], %s897_s4 }
  0x53   : > { %s168_s25 = scalar_lea.vmem [#allocation5], %s520_s30 }
  0x54   : > { %712 = dma.done.wait (%p983_p3), %s165_s6, 128  }
  0x55   : > { %714 = vsyncadd (%p983_p3), %s165_s6, 4294967168  ;;  %v737_v0 = vmov 0.0   ;;  %vm738_vm0 = vmmov 0   ;;  %vm202_vm1 = vcmask 261120   ;;  %v193_v1 = vld [vmem:[%s168_s25] sm:$0xff]  ;;  %v281_v4 = vlaneseq  ;;  %s525_s20 = sshll.u32 %s776_s13, 4 }
  0x56   : > { %532 = vmatprep.subr.mxu0 %v737_v0  ;;  %534 = vmatprep.mubr.msk.f32.mxu0 %vm738_vm0, %v737_v0  ;;  %v276_v2 = vmul.f32 %v193_v1, %v193_v1  ;;  %vm311_vm3 = vcmask 64512   ;;  %v521_v26 = vld [vmem:[%s159_s7] ss:$0 sm:$0xff]  ;;  %s191_s8 = scalar_lea.vmem [#allocation7], %s897_s4  ;;  %vm412_vm4 = vcmask 57344   ;;  %s925_s14 = scalar_lea.hbm %s971_s2, %s525_s20 }
  0x57   : > { %537 = vmatprep.subr.mxu1 %v737_v0  ;;  %539 = vmatprep.mubr.msk.f32.mxu1 %vm738_vm0, %v737_v0  ;;  %v282_v5 = vand.u32 127, %v281_v4  ;;  %v284_v6 = vshrl.u32 %v281_v4, 7  ;;  %v200_v27 = vsub.f32 %v521_v26, %v193_v1  ;;  %s427_s27 = sshll.u32 %s191_s8, 4  ;;  %s415_s16 = scalar_lea.sflag [#allocation4], %s897_s4  ;;  %s927_s27 = int_to_ptr.vmem [resolvable:$true] %s427_s27 }
  0x58   : > { %533 = vmatpush3.xpose.msk.msra.mxu0 %vm202_vm1, %v193_v1  ;;  %v277_v3 = vsel %vm202_vm1, %v276_v2, 0.0  ;;  %s663_s17 = scalar_lea.vmem %s927_s27, 16  ;;  %p984_p13 = scmp.ne.s32.totalorder %s976_s21, 0 }
  0x59   : > { %278 = vadd.xlane.f32.xlu0 %v277_v3  ;;  %v285_v7 = vsub.s32 %v282_v5, %v284_v6  ;;  %vm309_vm2 = vcmp.eq.s32.totalorder %v284_v6, %v282_v5  ;;  %v201_v28 = vmul.f32 %v200_v27, %v200_v27  ;;  %p664_p6 = scmp.ne.s32.totalorder %s927_s27, %s663_s17  ;;  %s739_s13 = smov [#allocation7]  }
  0x5a   : > { %s667_s19 = sshll.u32 %s739_s13, 4  ;;  %s668_s19 = int_to_ptr.vmem [resolvable:$false] %s667_s19 }
  0x5b   : > { %535 = vmatmul.mubr.msk.f32.vlgmr.msra.gmra.mrb[0].mxu0 %vm202_vm1, %v193_v1  ;;  %538 = vmatpush3.msra.mxu1 %v201_v28  ;;  %v397_v32 = vmul.f32 0.05, %v201_v28  ;;  %p665_p7 = pnand %p664_p6, %p984_p13  ;;  %s669_s23 = scalar_lea.vmem %s668_s19, 32 }
  0x5c   : > { %p670_p8 = scmp.lt.s32.totalorder %s927_s27, %s668_s19  ;;  %p671_p9 = scmp.lt.s32.totalorder %s669_s23, %s663_s17 }
  0x5d   : > { %p666_p5 = pneg %p665_p7 }
  0x5e   : > { %p672_p0 = por %p671_p9, %p670_p8 }
  0x60   : > { %p673_p1 = pnand %p672_p0, %p666_p5 }
  0xe6   : > { %v279_v8 = vpop.xlane.xlu0 %278 }
  0xe7   : > { %v286_v9 = vrot.slane %v279_v8, %v285_v7 }
  0xe9   : > { %v300_v11 = vadd.f32 %v286_v9, %v279_v8 }
 0x12e   : > { %v272_v10 = vpop.f32.mrb[0].mxu0 }
 0x12f   : > { %v301_v12 = vmul.f32 2.0, %v272_v10  ;;  %v536_v13 = vpop.f32.mrb[1].mxu0 }
 0x131   : > { %v302_v14 = vsub.f32 %v300_v11, %v301_v12 }
 0x133   : > { %v303_v15 = vmax.f32 %v302_v14, 0.0 }
 0x135   : > { %v304_v16 = vsub.f32 0.0, %v303_v15 }
 0x137   : > { %v305_v17 = vmul.f32 1.442695, %v304_v16 }
 0x139   : > { %595 = vpow2.f32 %v305_v17 }
 0x143   : > { %v596_v18 = vpop.eup %595 }
 0x144   : > { %v310_v19 = vsel %vm309_vm2, -99.0, %v596_v18 }
 0x145   : > { %v312_v20 = vsel %vm311_vm3, %v310_v19, -inf }
 0x146   : > { %313 = vmax.xlane.f32.xlu0 %v312_v20 }
 0x1d3   : > { %v314_v21 = vpop.xlane.xlu0 %313 }
 0x1d4   : > { %v315_v22 = vsub.f32 %v310_v19, %v314_v21 }
 0x1d6   : > { %v316_v23 = vmul.f32 1.442695, %v315_v22 }
 0x1d8   : > { %597 = vpow2.f32 %v316_v23 }
 0x1e2   : > { %v598_v24 = vpop.eup %597 }
 0x1e3   : > { %v318_v25 = vsel %vm311_vm3, %v598_v24, 0.0 }
 0x1e4   : > { %319 = vadd.xlane.f32.xlu1 %v318_v25 }
 0x271   : > { %v320_v29 = vpop.xlane.xlu1 %319 }
 0x272   : > { %599 = vrcp.f32 %v320_v29 }
 0x27c   : > { %v600_v30 = vpop.eup %599 }
 0x27d   : > { %v322_v31 = vmul.f32 %v600_v30, %v598_v24 }
 0x27f   : > { %540 = vmatmul.mubr.msk.f32.vlgmr.msra.gmra.mrb[0].mxu1 %vm311_vm3, %v322_v31 }
 0x352   : > { %v392_v33 = vpop.f32.mrb[0].mxu1 }
 0x353   : > { %v396_v34 = vmul.f32 0.95, %v392_v33  ;;  %v541_v35 = vpop.f32.mrb[1].mxu1 }
 0x355   : > { %v398_v36 = vadd.f32 %v397_v32, %v396_v34 }
 0x357   : > { %v399_v37 = vmul.f32 %v398_v36, %v398_v36 }
 0x359   : > { %v400_v38 = vsel %vm202_vm1, %v399_v37, 0.0 }
 0x35a   : > { %401 = vadd.xlane.f32.xlu1 %v400_v38 }
 0x3e7   : > { %v402_v39 = vpop.xlane.xlu1 %401 }
 0x3e8   : > { %v403_v40 = vsub.f32 0.0, %v402_v39 }
 0x3ea   : > { %v404_v41 = vmul.f32 1.442695, %v403_v40 }
 0x3ec   : > { %601 = vpow2.f32 %v404_v41 }
 0x3f6   : > { %v602_v42 = vpop.eup %601 }
 0x3f7   : > { %v410_v43 = vrot.slane %v602_v42, %v285_v7 }
 0x3f9   : > { %413 = vst.msk [vmem:[%s191_s8] sm:$0x1] %vm412_vm4, %v410_v43 }
 0x3fa   : > { %676 = shalt.err (!%p673_p1)
}
 0x3fb   : > { %s677_s24 = scalar_lea.hbm %s925_s14, 16  ;;  %s681_s4 = scalar_lea.hbm %s971_s2, 32 }
 0x3fc   : > { %p678_p11 = scmp.ne.s32.totalorder %s925_s14, %s677_s24  ;;  %p682_p4 = scmp.lt.u32.totalorder %s925_s14, %s971_s2 }
 0x3fd   : > { %p683_p10 = scmp.lt.u32.totalorder %s681_s4, %s677_s24  ;;  %p685_p6 = scmp.lt.u32.totalorder %s677_s24, %s925_s14 }
 0x3fe   : > { %p679_p12 = pnand %p678_p11, %p984_p13 }
 0x3ff   : > { %p684_p3 = por %p683_p10, %p682_p4 }
 0x400   : > { %p680_p2 = pneg %p679_p12 }
 0x401   : > { %p686_p7 = por %p685_p6, %p684_p3 }
 0x403   : > { %p687_p5 = pnand %p686_p7, %p680_p2 }
 0x405   : > { %690 = shalt.err (!%p687_p5)
}
 0x406   : > { %546 = dma.vmem_to_hbm [thread:$0]  (%p984_p13), %s927_s27, 16, %s925_s14, %s415_s16  }
 0x407 PF: > { %s439_s30 = sand.u32 1, %s721_s9   ;;  %p985_p8 = scmp.ne.s32.totalorder %s977_s22, 0 }
 0x408   : > { %p986_p9 = scmp.ge.s32.totalorder %s733_s12, 2  ;;  %s440_s6 = scalar_lea.sflag [#allocation4], %s439_s30 }
 0x40a   : > { %p556_p0 = pnand %p986_p9, %p985_p8 }
 0x40c   : > { %716 = dma.done.wait (!%p556_p0), %s440_s6, 16  }
 0x40d   : > { %718 = vsyncadd (!%p556_p0), %s440_s6, 4294967280  ;;  %p18_p1 = scmp.ge.s32.totalorder %s780_s15, 4   ;;  %s987_s9 = smov %s725_s10 }
 0x40e   : > { %s988_s10 = smov %s729_s11  ;;  %s989_s11 = smov %s792_s18 }
 0x40f   : > { %s990_s12 = smov %s780_s15  ;;  %20 = sbr.rel (!%p18_p1) target bundleno = 7 (0x7), region = 86 }
 0x416   :  { %444 = vsyncpa [#allocation3], 1 }
 0x417   :  { %446 = vsyncpa [#allocation3 + $0x1], 1 }
 0x418   :  { %447 = vsyncpa [#allocation6], 1 }
 0x419   :  { %449 = vsyncpa [#allocation6 + $0x1], 1 }
 0x41a   :  { %450 = vsyncpa [#allocation4], 1 }
 0x41b   :  { %452 = vsyncpa [#allocation4 + $0x1], 1 }

</bundles_post_ra>
